<compile_context>
chip_gen: v5e
topology: v5e:2x2
jax: 0.10.0
libtpu: 0.0.40
codegen_flags: <defaults>
</compile_context>

<pallas_src>
import functools

import jax
import jax.numpy as jnp
from jax.experimental import pallas as pl
from jax.experimental.pallas import tpu as pltpu


def _round_up(x, m):
    return ((x + m - 1) // m) * m


def rnn_seq_kernel(xp_ref, h0_ref, wh_ref, out_ref, h_scr, *, H, O, TT):
    """One grid step = TT RNN time steps for one batch block.

    xp_ref : [TT, BB, C_pad]  precomputed x @ W_x + b for these TT steps
    h0_ref : [BB, C_pad]      initial hidden for this batch block (cols >= H zero)
    wh_ref : [C_pad, C_pad]   fused hidden->(hidden|output) weights (rows >= H zero)
    out_ref: [TT, BB, C_pad]  per-step slab: cols [0,H)=new hidden, [H,H+O)=log-softmax
    h_scr  : [BB, C_pad] f32  VMEM hidden carry across time blocks
    """
    t_blk = pl.program_id(1)

    # Initialise the VMEM-resident hidden carry on the first time block only
    # (per batch block; the batch axis is the leading "parallel" grid axis).
    @pl.when(t_blk == 0)
    def _():
        h_scr[...] = h0_ref[...].astype(jnp.float32)

    # Hoisted out of the unrolled inner loop: lane masks + the weight load.
    BB, C_pad = h_scr.shape
    col = jax.lax.broadcasted_iota(jnp.int32, (BB, C_pad), 1)
    is_logit = (col >= H) & (col < H + O)
    is_hidden = col < H
    neg_inf = jnp.float32(-jnp.inf)
    wh = wh_ref[...]                                   # VMEM-resident weights

    def step(i, carry):
        h = h_scr[...]                                 # [BB, C_pad] f32
        # Serial critical path: one MXU matmul + add (input projection was
        # hoisted out of the recurrence). Rows >= H of W_h are zero, so only
        # the hidden lanes [0, H) of the carry contribute.
        combined = (
            jnp.dot(h.astype(wh.dtype), wh, preferred_element_type=jnp.float32)
            + xp_ref[i].astype(jnp.float32)
        )                                              # [BB, C_pad] f32

        # Write the carry first so the log-softmax of step i (XLU/EUP/VPU) can
        # overlap the h @ W_h MXU push of step i+1 in the unrolled schedule.
        h_scr[...] = combined

        # Numerically-stable log-softmax restricted to the logits lanes
        # [H, H+O). Non-logit lanes are masked to -inf BEFORE exp (exp(-inf)=0),
        # so no inf/NaN can leak in from hidden/padding lanes.
        m = jnp.max(jnp.where(is_logit, combined, neg_inf), axis=1, keepdims=True)
        shifted = combined - m
        sum_exp = jnp.sum(jnp.exp(jnp.where(is_logit, shifted, neg_inf)),
                          axis=1, keepdims=True)
        log_probs = shifted - jnp.log(sum_exp)

        # Single lane-dense store per step: hidden lanes keep the linear
        # output, logits lanes get the log-softmax, padding lanes don't-care.
        out_ref[i] = jnp.where(is_hidden, combined, log_probs).astype(out_ref.dtype)
        return carry

    jax.lax.fori_loop(0, TT, step, 0, unroll=True)


def prepare_params(w_ih, b_ih, w_io, b_io, input_size, param_dtype=jnp.float32):
    """One-time weight prep (hoisted out of the recurrence path).

    w_ih: [H, I+H], b_ih: [H], w_io: [O, I+H], b_io: [O]   (PyTorch nn.Linear layout)

    Returns fused, transposed, lane-padded weights:
      w_x: [I, C_pad] f32, w_h: [C_pad, C_pad] param_dtype, b: [1, C_pad] f32,
    where cols [0,H) = hidden projection, cols [H,H+O) = output projection,
    C_pad = round_up(H+O, 128), and rows >= H of w_h are zero.
    On v6e/v7x pass param_dtype=jnp.bfloat16 to halve W_h VMEM/DMA bytes
    (accumulation in the kernel stays f32).
    """
    I = input_size
    H = w_ih.shape[0]
    O = w_io.shape[0]
    C = H + O
    C_pad = _round_up(C, 128)

    w_x = jnp.concatenate([w_ih[:, :I].T, w_io[:, :I].T], axis=1)   # [I, H+O]
    w_h = jnp.concatenate([w_ih[:, I:].T, w_io[:, I:].T], axis=1)   # [H, H+O]
    b = jnp.concatenate([b_ih, b_io]).reshape(1, C)                 # [1, H+O]

    w_x = jnp.pad(w_x, ((0, 0), (0, C_pad - C))).astype(jnp.float32)
    w_h = jnp.pad(w_h, ((0, C_pad - H), (0, C_pad - C))).astype(param_dtype)
    b = jnp.pad(b, ((0, 0), (0, C_pad - C))).astype(jnp.float32)
    return dict(w_x=w_x, w_h=w_h, b=b, I=I, H=H, O=O, C_pad=C_pad)


def rnn_sequence(x_seq, h0, params, *, time_block=8, batch_block=None):
    """Run the RNN cell over a whole sequence in ONE pallas_call.

    x_seq: [T, B, I]   h0: [B, H]
    returns (log_softmax_outputs [T, B, O], hidden_states [T, B, H]).
    """
    T, B, I = x_seq.shape
    H, O, C_pad = params["H"], params["O"], params["C_pad"]

    B_pad = _round_up(B, 8)
    BB = _round_up(batch_block, 8) if batch_block is not None else B_pad
    B_pad = _round_up(B_pad, BB)
    TT = max(1, min(time_block, T))
    T_pad = _round_up(T, TT)

    x_p = jnp.pad(x_seq.astype(jnp.float32),
                  ((0, T_pad - T), (0, B_pad - B), (0, 0)))          # [T_pad, B_pad, I]
    h0_p = jnp.pad(h0.astype(jnp.float32),
                   ((0, B_pad - B), (0, C_pad - H)))                 # [B_pad, C_pad]

    # Hoist the input projection out of the recurrence: one large MXU-friendly
    # matmul (+bias) for the whole sequence, pipelined into the kernel as a
    # [TT, BB, C_pad] slab per grid iteration.
    xproj = (jnp.einsum("tbi,ic->tbc", x_p, params["w_x"],
                        preferred_element_type=jnp.float32)
             + params["b"][None])                                    # [T_pad, B_pad, C_pad]
    xproj = xproj.astype(params["w_h"].dtype)

    kernel = functools.partial(rnn_seq_kernel, H=H, O=O, TT=TT)

    # NOTE: at realistic sizes (large H) set vmem_limit_bytes explicitly
    # (v7x has 64 MiB physical vs 128 MiB on v5e/v6e) and consider
    # pipeline_mode=pl.Buffered(1) on the grid-invariant W_h spec.
    out_slab = pl.pallas_call(
        kernel,
        out_shape=jax.ShapeDtypeStruct((T_pad, B_pad, C_pad), x_seq.dtype),
        grid=(B_pad // BB, T_pad // TT),
        in_specs=[
            pl.BlockSpec((TT, BB, C_pad), lambda b, t: (t, b, 0)),   # precomputed x-proj
            pl.BlockSpec((BB, C_pad), lambda b, t: (b, 0)),          # h0 (per batch block)
            pl.BlockSpec((C_pad, C_pad), lambda b, t: (0, 0)),       # W_h (VMEM-resident)
        ],
        out_specs=pl.BlockSpec((TT, BB, C_pad), lambda b, t: (t, b, 0)),
        scratch_shapes=[pltpu.VMEM((BB, C_pad), jnp.float32)],       # hidden carry
        compiler_params=pltpu.CompilerParams(
            dimension_semantics=("parallel", "arbitrary")),          # batch || , time serial
    )(xproj, h0_p, params["w_h"])

    outputs = out_slab[:T, :B, H:H + O]     # [T, B, O] log-softmax
    hiddens = out_slab[:T, :B, :H]          # [T, B, H]
    return outputs, hiddens


def rnn_cell(x, h, params):
    """One cell step == the PyTorch RNN.forward(input, hidden)."""
    out, hid = rnn_sequence(x[None], h, params, time_block=1)
    return out[0], hid[0]


def init_params(key, input_size, hidden_size, output_size, dtype=jnp.float32):
    """Deterministic init matching nn.Linear's U(-1/sqrt(fan_in), 1/sqrt(fan_in))."""
    combined = input_size + hidden_size
    k1, k2, k3, k4 = jax.random.split(key, 4)
    bound = 1.0 / jnp.sqrt(jnp.asarray(combined, dtype))
    w_ih = jax.random.uniform(k1, (hidden_size, combined), dtype, -bound, bound)
    b_ih = jax.random.uniform(k2, (hidden_size,), dtype, -bound, bound)
    w_io = jax.random.uniform(k3, (output_size, combined), dtype, -bound, bound)
    b_io = jax.random.uniform(k4, (output_size,), dtype, -bound, bound)
    return w_ih, b_ih, w_io, b_io


if __name__ == "__main__":
    INPUT_SIZE, HIDDEN_SIZE, OUTPUT_SIZE = 16, 32, 10
    BATCH, SEQ = 4, 13          # SEQ=13 exercises the time-block padding path

    key = jax.random.PRNGKey(0)
    kx, kh, kp = jax.random.split(key, 3)
    x_seq = jax.random.normal(kx, (SEQ, BATCH, INPUT_SIZE), jnp.float32)
    h0 = jax.random.normal(kh, (BATCH, HIDDEN_SIZE), jnp.float32)
    w_ih, b_ih, w_io, b_io = init_params(kp, INPUT_SIZE, HIDDEN_SIZE, OUTPUT_SIZE)

    # One-time parameter prep (hoisted out of the step path).
    # (On v6e/v7x pass param_dtype=jnp.bfloat16 and loosen the tolerances below.)
    params = prepare_params(w_ih, b_ih, w_io, b_io, INPUT_SIZE)

    # --- single step: exactly the PyTorch RNN.forward(input, hidden) ---
    out1, h1 = rnn_cell(x_seq[0], h0, params)
    jax.block_until_ready((out1, h1))

    combined = jnp.concatenate([x_seq[0], h0], axis=1)
    ref_h1 = combined @ w_ih.T + b_ih
    ref_out1 = jax.nn.log_softmax(combined @ w_io.T + b_io, axis=1)
    assert jnp.allclose(out1, ref_out1, atol=1e-4, rtol=1e-4), "single-step output mismatch"
    assert jnp.allclose(h1, ref_h1, atol=1e-4, rtol=1e-4), "single-step hidden mismatch"

    # --- fused multi-step recurrence (one pallas_call, time-blocked TT=8) ---
    outs, hids = rnn_sequence(x_seq, h0, params, time_block=8)
    jax.block_until_ready((outs, hids))

    def ref_step(h, x_t):
        c = jnp.concatenate([x_t, h], axis=1)
        nh = c @ w_ih.T + b_ih
        o = jax.nn.log_softmax(c @ w_io.T + b_io, axis=1)
        return nh, (o, nh)

    _, (ref_outs, ref_hids) = jax.lax.scan(ref_step, h0, x_seq)
    assert jnp.allclose(outs, ref_outs, atol=1e-3, rtol=1e-3), "sequence output mismatch"
    assert jnp.allclose(hids, ref_hids, atol=1e-3, rtol=1e-3), "sequence hidden mismatch"

    print("KERNEL_OK")
</pallas_src>

<mosaic_0001>
module attributes {stable_mosaic.version = 11 : i64} {
  func.func @rnn_seq_kernel(%arg0: i32, %arg1: i32, %arg2: memref<1x8x128xf32, #tpu.memory_space<vmem>>, %arg3: memref<8x128xf32, #tpu.memory_space<vmem>>, %arg4: memref<128x128xf32, #tpu.memory_space<vmem>>, %arg5: memref<1x8x128xf32, #tpu.memory_space<vmem>>, %arg6: memref<8x128xf32, #tpu.memory_space<vmem>>) attributes {dimension_semantics = [#tpu.dimension_semantics<parallel>, #tpu.dimension_semantics<arbitrary>], iteration_bounds = array<i64: 1, 1>, scalar_prefetch = 0 : i64, scratch_operands = 1 : i64, tpu.core_type = #tpu.core_type<tc>, window_params = [{transform_indices = @transform_0, window_bounds = array<i64: 1, 8, 128>}, {transform_indices = @transform_1, window_bounds = array<i64: 8, 128>}, {pipeline_mode = #tpu.pipeline_mode<synchronous>, transform_indices = @transform_2, window_bounds = array<i64: 128, 128>}, {transform_indices = @transform_3, window_bounds = array<i64: 1, 8, 128>}]} {
    %c0_i32 = arith.constant 0 : i32
    %0 = arith.cmpi eq, %arg1, %c0_i32 : i32
    %1 = arith.extui %0 : i1 to i32
    %c0_i32_0 = arith.constant 0 : i32
    %2 = arith.cmpi ne, %1, %c0_i32_0 : i32
    scf.if %2 {
      %c0_15 = arith.constant 0 : index
      %c0_16 = arith.constant 0 : index
      %38 = vector.load %arg3[%c0_15, %c0_16] : memref<8x128xf32, #tpu.memory_space<vmem>>, vector<8x128xf32>
      %c0_17 = arith.constant 0 : index
      %c0_18 = arith.constant 0 : index
      %39 = vector.load %arg6[%c0_17, %c0_18] : memref<8x128xf32, #tpu.memory_space<vmem>>, vector<8x128xf32>
      tpu.vector_store %arg6[%c0_17, %c0_18], %38 {strides = array<i32>} : memref<8x128xf32, #tpu.memory_space<vmem>>, vector<8x128xf32>,
    } else {
    }
    %3 = tpu.iota {dimensions = array<i32: 1>} : vector<8x128xi32>
    %c32_i32 = arith.constant 32 : i32
    %4 = vector.broadcast %c32_i32 : i32 to vector<8x128xi32>
    %5 = arith.cmpi sge, %3, %4 : vector<8x128xi32>
    %c42_i32 = arith.constant 42 : i32
    %6 = vector.broadcast %c42_i32 : i32 to vector<8x128xi32>
    %7 = arith.cmpi slt, %3, %6 : vector<8x128xi32>
    %8 = arith.andi %5, %7 : vector<8x128xi1>
    %c32_i32_1 = arith.constant 32 : i32
    %9 = vector.broadcast %c32_i32_1 : i32 to vector<8x128xi32>
    %10 = arith.cmpi slt, %3, %9 : vector<8x128xi32>
    %c0 = arith.constant 0 : index
    %c0_2 = arith.constant 0 : index
    %11 = vector.load %arg4[%c0, %c0_2] : memref<128x128xf32, #tpu.memory_space<vmem>>, vector<128x128xf32>
    %cst = arith.constant 0xFF800000 : f32
    %c0_i32_3 = arith.constant 0 : i32
    %c0_4 = arith.constant 0 : index
    %c0_5 = arith.constant 0 : index
    %12 = vector.load %arg6[%c0_4, %c0_5] : memref<8x128xf32, #tpu.memory_space<vmem>>, vector<8x128xf32>
    %cst_6 = arith.constant dense<0.000000e+00> : vector<8x128xf32>
    %13 = tpu.matmul %12, %11, %cst_6 {dimension_numbers = #tpu.dot_dimension_numbers<[1], [0], [0], [1], [0, 0, 1, 1], [], []>} : vector<8x128xf32>, vector<128x128xf32>, vector<8x128xf32> -> vector<8x128xf32>
    %14 = arith.index_cast %c0_i32_3 : i32 to index
    %c0_7 = arith.constant 0 : index
    %c0_8 = arith.constant 0 : index
    %15 = vector.load %arg2[%14, %c0_7, %c0_8] : memref<1x8x128xf32, #tpu.memory_space<vmem>>, vector<1x8x128xf32>
    %16 = vector.shape_cast %15 : vector<1x8x128xf32> to vector<8x128xf32>
    %17 = arith.addf %13, %16 : vector<8x128xf32>
    %c0_9 = arith.constant 0 : index
    %c0_10 = arith.constant 0 : index
    %18 = vector.load %arg6[%c0_9, %c0_10] : memref<8x128xf32, #tpu.memory_space<vmem>>, vector<8x128xf32>
    tpu.vector_store %arg6[%c0_9, %c0_10], %17 {strides = array<i32>} : memref<8x128xf32, #tpu.memory_space<vmem>>, vector<8x128xf32>,
    %19 = vector.broadcast %cst : f32 to vector<8x128xf32>
    %20 = arith.select %8, %17, %19 : vector<8x128xi1>, vector<8x128xf32>
    %cst_11 = arith.constant dense<0xFF800000> : vector<8xf32>
    %21 = vector.multi_reduction <maximumf>, %20, %cst_11 [1] : vector<8x128xf32> to vector<8xf32>
    %22 = vector.shape_cast %21 : vector<8xf32> to vector<8x1xf32>
    %23 = vector.broadcast %22 : vector<8x1xf32> to vector<8x128xf32>
    %24 = arith.subf %17, %23 : vector<8x128xf32>
    %25 = vector.broadcast %cst : f32 to vector<8x128xf32>
    %26 = arith.select %8, %24, %25 : vector<8x128xi1>, vector<8x128xf32>
    %27 = math.exp %26 : vector<8x128xf32>
    %cst_12 = arith.constant dense<0.000000e+00> : vector<8xf32>
    %28 = vector.multi_reduction <add>, %27, %cst_12 [1] : vector<8x128xf32> to vector<8xf32>
    %29 = vector.shape_cast %28 : vector<8xf32> to vector<8x1xf32>
    %30 = math.log %29 : vector<8x1xf32>
    %31 = vector.broadcast %30 : vector<8x1xf32> to vector<8x128xf32>
    %32 = arith.subf %24, %31 : vector<8x128xf32>
    %33 = arith.select %10, %17, %32 : vector<8x128xi1>, vector<8x128xf32>
    %34 = arith.index_cast %c0_i32_3 : i32 to index
    %c0_13 = arith.constant 0 : index
    %c0_14 = arith.constant 0 : index
    %35 = vector.load %arg5[%34, %c0_13, %c0_14] : memref<1x8x128xf32, #tpu.memory_space<vmem>>, vector<1x8x128xf32>
    %36 = vector.shape_cast %35 : vector<1x8x128xf32> to vector<8x128xf32>
    %37 = vector.shape_cast %33 : vector<8x128xf32> to vector<1x8x128xf32>
    tpu.vector_store %arg5[%34, %c0_13, %c0_14], %37 {strides = array<i32>} : memref<1x8x128xf32, #tpu.memory_space<vmem>>, vector<1x8x128xf32>,
    %c1_i32 = arith.constant 1 : i32
    return
  }
  func.func @transform_0(%arg0: i32, %arg1: i32) -> (i32, i32, i32) {
    %c0_i32 = arith.constant 0 : i32
    %c0_i32_0 = arith.constant 0 : i32
    return %arg1, %arg0, %c0_i32 : i32, i32, i32
  }
  func.func @transform_1(%arg0: i32, %arg1: i32) -> (i32, i32) {
    %c0_i32 = arith.constant 0 : i32
    %c0_i32_0 = arith.constant 0 : i32
    return %arg0, %c0_i32 : i32, i32
  }
  func.func @transform_2(%arg0: i32, %arg1: i32) -> (i32, i32) {
    %c0_i32 = arith.constant 0 : i32
    %c0_i32_0 = arith.constant 0 : i32
    %c0_i32_1 = arith.constant 0 : i32
    return %c0_i32, %c0_i32_0 : i32, i32
  }
  func.func @transform_3(%arg0: i32, %arg1: i32) -> (i32, i32, i32) {
    %c0_i32 = arith.constant 0 : i32
    %c0_i32_0 = arith.constant 0 : i32
    return %arg1, %arg0, %c0_i32 : i32, i32, i32
  }
}

</mosaic_0001>

<bundles_post_ra>
// kernel: tpu_custom_call.1
= control target key start
LH: loop header
LB: loop body
LE: loop exit
PB: predicated region body
PF: predicated region fallthrough
CT: control target
= control target key end

     0   :  { %8 = vsyncpa [#allocation4], 0  ;;  %s291_s0 = inlined_call_operand.hbm [shape: f32[1,8,128], index: 0, kind: input, shape index: {}]   ;;  %s292_s1 = inlined_call_operand.hbm [shape: f32[8,128], index: 1, kind: input, shape index: {}]   ;;  %s293_s2 = inlined_call_operand.hbm [shape: f32[128,128], index: 2, kind: input, shape index: {}]   ;;  %s294_s3 = inlined_call_operand.hbm [shape: f32[1,8,128], index: 3, kind: output, shape index: {}]  }
   0x1   :  { %9 = vsyncpa [#allocation7], 0  ;;  %s27_s14 = sshll.u32 %s292_s1, 4  ;;  %s28_s14 = int_to_ptr.hbm [resolvable:$true] %s27_s14 }
   0x2   :  { %10 = vsyncpa [#allocation5], 0  ;;  %s253_s15 = smov [#allocation6]   ;;  %s16_s19 = sshll.u32 %s291_s0, 4  ;;  %s17_s19 = int_to_ptr.hbm [resolvable:$true] %s16_s19 }
   0x3   :  { %s29_s16 = sshll.u32 %s253_s15, 4  ;;  %s254_s20 = smov [#allocation3]   ;;  %s30_s16 = int_to_ptr.vmem [resolvable:$true] %s29_s16 }
   0x4   :  { %32 = dma.hbm_to_vmem [thread:$0]  %s28_s14, 128, %s30_s16, [#allocation7]  }
   0x5   :  { %s18_s21 = sshll.u32 %s254_s20, 4  ;;  %s37_s24 = sshll.u32 %s293_s2, 4  ;;  %s19_s21 = int_to_ptr.vmem [resolvable:$true] %s18_s21  ;;  %s38_s24 = int_to_ptr.hbm [resolvable:$true] %s37_s24 }
   0x6   :  { %21 = dma.hbm_to_vmem [thread:$0]  %s17_s19, 128, %s19_s21, [#allocation4]  }
   0x7   :  { %s255_s1 = smov [#allocation8]   ;;  %s256_s26 = smov 128  }
   0x8   :  { %s39_s25 = sshll.u32 %s255_s1, 4  ;;  %s257_s27 = smov 8   ;;  %s40_s25 = int_to_ptr.vmem [resolvable:$true] %s39_s25 }
   0x9   :  { %45 = dma.hbm_to_vmem [thread:$0]  %s38_s24, 2048, %s40_s25, [#allocation7], %s256_s26, %s256_s26, %s257_s27  }
   0xa   :  { %247 = dma.done.wait [#allocation4], 128  }
   0xb   :  { %248 = vsyncadd [#allocation4], 4294967168 }
   0xc   :  { %249 = dma.done.wait [#allocation7], 2176  }
   0xd   :  { %250 = vsyncadd [#allocation7], 4294965120  ;;  %v85_v0 = vld [vmem:[#allocation8 + $0x78] sm:$0xff]  ;;  %v84_v1 = vld [vmem:[#allocation8 + $0x70] sm:$0xff]  ;;  %v64_v17 = vlaneseq  ;;  %s258_s0 = smov [#allocation9]   ;;  %s130_s30 = sshll.u32 %s294_s3, 4  ;;  %s131_s30 = int_to_ptr.hbm [resolvable:$true] %s130_s30 }
   0xe   :  { %88 = vmatpush.msra.mxu0 %v85_v0  ;;  %v83_v2 = vld [vmem:[#allocation8 + $0x68] sm:$0xff]  ;;  %v82_v3 = vld [vmem:[#allocation8 + $0x60] sm:$0xff]  ;;  %v81_v4 = vld [vmem:[#allocation8 + $0x58] sm:$0xff]  ;;  %s128_s2 = sshll.u32 %s258_s0, 4  ;;  %s129_s2 = int_to_ptr.vmem [resolvable:$true] %s128_s2 }
   0xf   :  { %v80_v5 = vld [vmem:[#allocation8 + $0x50] sm:$0xff]  ;;  %v79_v6 = vld [vmem:[#allocation8 + $0x48] sm:$0xff]  ;;  %v78_v7 = vld [vmem:[#allocation8 + $0x40] sm:$0xff]  ;;  %v65_v18 = vand.u32 127, %v64_v17 }
  0x10   :  { %89 = vmatpush.msra.mxu0 %v84_v1  ;;  %v77_v8 = vld [vmem:[#allocation8 + $0x38] sm:$0xff]  ;;  %v76_v9 = vld [vmem:[#allocation8 + $0x30] sm:$0xff]  ;;  %v75_v10 = vld [vmem:[#allocation8 + $0x28] sm:$0xff] }
  0x11   :  { %v74_v11 = vld [vmem:[#allocation8 + $0x20] sm:$0xff]  ;;  %v73_v12 = vld [vmem:[#allocation8 + $0x18] sm:$0xff]  ;;  %v72_v13 = vld [vmem:[#allocation8 + $0x10] sm:$0xff]  ;;  %vm66_vm0 = vcmp.ge.s32.totalorder %v65_v18, 32  ;;  %vm67_vm1 = vcmp.lt.s32.totalorder %v65_v18, 42  ;;  %vm69_vm3 = vcmp.lt.s32.totalorder %v65_v18, 32 }
  0x12   :  { %90 = vmatpush.msra.mxu0 %v83_v2  ;;  %v71_v14 = vld [vmem:[#allocation8 + $0x8] sm:$0xff]  ;;  %v70_v15 = vld [vmem:[#allocation8] sm:$0xff]  ;;  %v62_v16 = vld [vmem:[#allocation6] sm:$0xff] }
  0x13   :  { %v87_v19 = vld [vmem:[#allocation3] sm:$0xff]  ;;  %vm68_vm2 = vmand %vm66_vm0, %vm67_vm1 }
  0x14   :  { %91 = vmatpush.msra.mxu0 %v82_v3 }
  0x16   :  { %92 = vmatpush.msra.mxu0 %v81_v4 }
  0x18   :  { %93 = vmatpush.msra.mxu0 %v80_v5 }
  0x1a   :  { %94 = vmatpush.msra.mxu0 %v79_v6 }
  0x1c   :  { %95 = vmatpush.msra.mxu0 %v78_v7 }
  0x1e   :  { %96 = vmatpush.msra.mxu0 %v77_v8 }
  0x20   :  { %97 = vmatpush.msra.mxu0 %v76_v9 }
  0x22   :  { %98 = vmatpush.msra.mxu0 %v75_v10 }
  0x24   :  { %99 = vmatpush.msra.mxu0 %v74_v11 }
  0x26   :  { %100 = vmatpush.msra.mxu0 %v73_v12 }
  0x28   :  { %101 = vmatpush.msra.mxu0 %v72_v13 }
  0x2a   :  { %102 = vmatpush.msra.mxu0 %v71_v14 }
  0x2c   :  { %103 = vmatpush.msra.mxu0 %v70_v15 }
  0x2d   :  { %104 = vmatmul.f32.vlgmr.msra.gmra.mxu0 %v62_v16 }
  0xaa   :  { %v105_v20 = vpop.f32.mrf.mxu0 }
  0xab   :  { %v106_v21 = vadd.f32 %v105_v20, %v87_v19 }
  0xad   :  { %v109_v22 = vsel %vm68_vm2, %v106_v21, -inf }
  0xae   :  { %110 = vmax.xlane.f32.xlu0 %v109_v22 }
 0x121   :  { %v111_v23 = vpop.xlane.xlu0 %110 }
 0x122   :  { %v112_v24 = vsub.f32 %v106_v21, %v111_v23 }
 0x124   :  { %v113_v25 = vsel %vm68_vm2, %v112_v24, -inf }
 0x125   :  { %v114_v26 = vmul.f32 1.442695, %v113_v25 }
 0x127   :  { %147 = vpow2.f32 %v114_v26 }
 0x12d   :  { %v148_v27 = vpop.eup %147 }
 0x12e   :  { %116 = vadd.xlane.f32.xlu0 %v148_v27 }
 0x1a1   :  { %v117_v28 = vpop.xlane.xlu0 %116 }
 0x1a2   :  { %149 = vlog2.f32 %v117_v28 }
 0x1a8   :  { %v150_v29 = vpop.eup %149 }
 0x1a9   :  { %v119_v30 = vmul.f32 0.6931472, %v150_v29 }
 0x1ab   :  { %v120_v31 = vsub.f32 %v112_v24, %v119_v30 }
 0x1ad   :  { %v121_v32 = vsel %vm69_vm3, %v106_v21, %v120_v31 }
 0x1ae   :  { %122 = vst [vmem:[#allocation9] sm:$0xff] %v121_v32 }
 0x1af   :  { %133 = dma.vmem_to_hbm [thread:$0]  %s129_s2, 128, %s131_s30, [#allocation5]  }
 0x1b0   :  { %251 = dma.done.wait [#allocation5], 128  }
 0x1b1   :  { %252 = vsyncadd [#allocation5], 4294967168 }
 0x1b2   :  { %138 = vsyncpa [#allocation4], 1 }
 0x1b3   :  { %139 = vsyncpa [#allocation7], 1 }
 0x1b4   :  { %140 = vsyncpa [#allocation5], 1 }

</bundles_post_ra>
